<compile_context>
chip_gen: v5e
topology: v5e:2x2
jax: 0.10.0
libtpu: 0.0.40
codegen_flags: <defaults>
</compile_context>

<pallas_src>
import functools

import jax
import jax.numpy as jnp
from jax.experimental import pallas as pl
from jax.experimental.pallas import tpu as pltpu

BN_EPS = 1e-5
K = 3       # conv kernel size (both layers)
POOL = 3    # MaxPool1d kernel == stride


# ---------------------------------------------------------------------------
# Single fused kernel: layer0 + layer1 + head
# ---------------------------------------------------------------------------
def fused_forward_kernel(x0_ref, w0_ref, b0_ref, w1_ref, b1_ref,
                         g_ref, a_ref, wc_ref, bc_ref, o_ref,
                         *, n_rows0, n_rows1):
    # n_rows0 = B * Lp0  : rows per pool-phase block of the layer0 matmul result
    # n_rows1 = n_rows0 - (K-1) : rows of the layer1 conv output (incl. unused
    #                             cross-batch rows, never selected by g_ref)

    # ---- layer0: one im2col matmul + folded-BN bias + ReLU ------------------
    c0 = jnp.dot(x0_ref[...], w0_ref[...],
                 preferred_element_type=jnp.float32)          # (3*n_rows0, 256)
    c0 = jnp.maximum(c0 + b0_ref[...], 0.0)
    # MaxPool1d(3): phase-major row blocks -> elementwise max (tile-aligned slices)
    h0 = jnp.maximum(jnp.maximum(c0[0:n_rows0], c0[n_rows0:2 * n_rows0]),
                     c0[2 * n_rows0:3 * n_rows0])             # (n_rows0, 256)

    # ---- layer1: 3-tap conv as K=256 matmuls on contiguous shifted slices ---
    c1 = jnp.dot(h0[0:n_rows1], w1_ref[0], preferred_element_type=jnp.float32)
    c1 = c1 + jnp.dot(h0[1:1 + n_rows1], w1_ref[1],
                      preferred_element_type=jnp.float32)
    c1 = c1 + jnp.dot(h0[2:2 + n_rows1], w1_ref[2],
                      preferred_element_type=jnp.float32)
    c1 = jnp.maximum(c1 + b1_ref[...], 0.0)                   # (n_rows1, 64)

    # ---- MaxPool1d(3) + AdaptiveAvgPool1d(1) via selection matmuls ----------
    p0 = jnp.dot(g_ref[0], c1, preferred_element_type=jnp.float32)
    p1 = jnp.dot(g_ref[1], c1, preferred_element_type=jnp.float32)
    p2 = jnp.dot(g_ref[2], c1, preferred_element_type=jnp.float32)
    pooled = jnp.maximum(jnp.maximum(p0, p1), p2)             # (B*Lp1, 64)
    hmean = jnp.dot(a_ref[...], pooled,
                    preferred_element_type=jnp.float32)       # (B, 64)

    # ---- head: (Dropout = identity) Linear -> softmax (exact division) ------
    logits = jnp.dot(hmean, wc_ref[...],
                     preferred_element_type=jnp.float32) + bc_ref[...]
    z = logits - jnp.max(logits, axis=1, keepdims=True)
    e = jnp.exp(z)
    o_ref[...] = e / jnp.sum(e, axis=1, keepdims=True)


def fused_forward(x0, w0, b0, w1, b1, G, A, wc, bc, *, batch, n_rows0, n_rows1):
    n_cls = wc.shape[-1]
    kernel = functools.partial(fused_forward_kernel,
                               n_rows0=n_rows0, n_rows1=n_rows1)

    def full(shape):
        n = len(shape)
        return pl.BlockSpec(shape, lambda i, _n=n: (0,) * _n)

    return pl.pallas_call(
        kernel,
        out_shape=jax.ShapeDtypeStruct((batch, n_cls), jnp.float32),
        grid=(1,),
        in_specs=[
            full(x0.shape),   # phase-major im2col of the input
            full(w0.shape),   # (K*C_in, 256)  BN-folded
            full(b0.shape),   # (1, 256)       BN-folded
            full(w1.shape),   # (K, 256, 64)   BN-folded
            full(b1.shape),   # (1, 64)        BN-folded
            full(G.shape),    # (POOL, B*Lp1, n_rows1) pool-selection matrices
            full(A.shape),    # (B, B*Lp1) temporal-mean matrix
            full(wc.shape),   # (64, n_cls) classifier weight
            full(bc.shape),   # (1, n_cls)  classifier bias
        ],
        out_specs=full((batch, n_cls)),
        compiler_params=pltpu.CompilerParams(
            dimension_semantics=("arbitrary",)),
    )(x0, w0, b0, w1, b1, G, A, wc, bc)


# ---------------------------------------------------------------------------
# Wrapper: BN fold + im2col / selection-matrix layout plumbing, under one jit
# ---------------------------------------------------------------------------
def _fold_bn(p):
    """Fold eval-mode BatchNorm1d into the preceding conv's weight / bias."""
    scale = p['gamma'][0] * jax.lax.rsqrt(p['var'][0] + BN_EPS)          # (C_out,)
    w = p['w'] * scale[None, None, :]                                     # (K, C_in, C_out)
    b = (p['beta'][0] + (p['b'][0] - p['mean'][0]) * scale)[None, :]      # (1, C_out)
    return w, b


@jax.jit
def model_1dcnn_pallas(x_ncl, params):
    # x_ncl: (B, nrois, T)  (PyTorch NCL layout)
    x = jnp.transpose(x_ncl.astype(jnp.float32), (0, 2, 1))               # (B, T, C_in)
    B, T, c_in = x.shape
    w0, b0 = _fold_bn(params['layer0'])                                   # (K,c_in,256), (1,256)
    w1, b1 = _fold_bn(params['layer1'])                                   # (K,256,64),  (1,64)
    pc = params['classify']

    l_conv0 = T - (K - 1)
    l_pool0 = l_conv0 // POOL
    l_conv1 = l_pool0 - (K - 1)
    l_pool1 = l_conv1 // POOL
    assert l_pool1 >= 1, "input sequence too short for two conv+pool blocks"

    # layer0 im2col (pure layout plumbing in XLA), phase-major rows:
    #   row index = p*(B*Lp0) + b*Lp0 + u   <->  conv position t = 3u + p
    xw = jnp.concatenate([x[:, j:j + POOL * l_pool0, :] for j in range(K)],
                         axis=-1)                                         # (B, 3*Lp0, K*c_in)
    xw = xw.reshape(B, l_pool0, POOL, K * c_in)
    x0 = jnp.transpose(xw, (2, 0, 1, 3)).reshape(POOL * B * l_pool0, K * c_in)
    w0f = w0.reshape(K * c_in, w0.shape[-1])                              # (K*c_in, 256)

    # Constant selection matrices for layer1 MaxPool(3) and AdaptiveAvgPool(1).
    n_rows0 = B * l_pool0                 # h0 rows (b*Lp0 + u)
    n_rows1 = n_rows0 - (K - 1)           # layer1 conv output rows
    m1 = B * l_pool1
    rows = jnp.arange(m1)                                                  # b*Lp1 + u
    base = (rows // l_pool1) * l_pool0 + POOL * (rows % l_pool1)           # b*Lp0 + 3u
    cols = jnp.arange(n_rows1)
    G = jnp.stack([(base[:, None] + p == cols[None, :]).astype(jnp.float32)
                   for p in range(POOL)], axis=0)                          # (POOL, m1, n_rows1)
    A = ((rows[None, :] // l_pool1) ==
         jnp.arange(B)[:, None]).astype(jnp.float32) / l_pool1             # (B, m1)

    return fused_forward(x0, w0f, b0, w1, b1, G, A, pc['w'], pc['b'],
                         batch=B, n_rows0=n_rows0, n_rows1=n_rows1)


# ---------------------------------------------------------------------------
# Pure-JAX reference (PyTorch NCL layout, lax.conv) for correctness check
# ---------------------------------------------------------------------------
def model_1dcnn_reference(x_ncl, params):
    def tconv(x, p):
        w_oik = jnp.transpose(p['w'], (2, 1, 0))                          # (C_out, C_in, k)
        y = jax.lax.conv_general_dilated(x, w_oik, window_strides=(1,),
                                         padding='VALID',
                                         dimension_numbers=('NCH', 'OIH', 'NCH'))
        y = y + p['b'][0][None, :, None]
        scale = p['gamma'][0] / jnp.sqrt(p['var'][0] + BN_EPS)
        y = (y - p['mean'][0][None, :, None]) * scale[None, :, None] \
            + p['beta'][0][None, :, None]
        y = jnp.maximum(y, 0.0)
        B, C, L = y.shape
        Lp = L // 3
        return y[:, :, :Lp * 3].reshape(B, C, Lp, 3).max(axis=-1)

    h0 = tconv(x_ncl.astype(jnp.float32), params['layer0'])
    h1 = tconv(h0, params['layer1'])
    h = h1.mean(axis=-1)                                                  # (B, 64)
    logits = h @ params['classify']['w'] + params['classify']['b'][0]
    return jax.nn.softmax(logits, axis=1)


def init_params(key, nrois, filters=(256, 64), kernels=(3, 3)):
    params = {}
    c_in = nrois
    for li, (c_out, k) in enumerate(zip(filters, kernels)):
        ks = jax.random.split(key, 7)
        key = ks[0]
        params[f'layer{li}'] = dict(
            # conv weight in kernel layout (k, C_in, C_out)
            w=0.05 * jax.random.normal(ks[1], (k, c_in, c_out), jnp.float32),
            b=0.05 * jax.random.normal(ks[2], (1, c_out), jnp.float32),
            gamma=1.0 + 0.1 * jax.random.normal(ks[3], (1, c_out), jnp.float32),
            beta=0.1 * jax.random.normal(ks[4], (1, c_out), jnp.float32),
            mean=0.1 * jax.random.normal(ks[5], (1, c_out), jnp.float32),
            var=jax.random.uniform(ks[6], (1, c_out), jnp.float32, 0.5, 1.5),
        )
        c_in = c_out
    k1, k2, _ = jax.random.split(key, 3)
    params['classify'] = dict(
        w=0.1 * jax.random.normal(k1, (filters[-1], 2), jnp.float32),     # (64, 2)
        b=0.1 * jax.random.normal(k2, (1, 2), jnp.float32),
    )
    return params


if __name__ == "__main__":
    B, NROIS, T = 2, 16, 64
    key = jax.random.PRNGKey(0)
    kx, kp = jax.random.split(key)
    x = jax.random.normal(kx, (B, NROIS, T), jnp.float32)   # PyTorch NCL input
    params = init_params(kp, NROIS)

    out = jax.block_until_ready(model_1dcnn_pallas(x, params))
    ref = jax.block_until_ready(model_1dcnn_reference(x, params))

    assert out.shape == (B, 2), out.shape
    err = float(jnp.max(jnp.abs(out - ref)))
    # Exact softmax now; tolerance covers the BN-folded / im2col f32
    # accumulation-order differences only.
    assert err < 2e-3, f"mismatch vs reference: {err}"
    print("KERNEL_OK")
</pallas_src>

<mosaic_0001>
module attributes {stable_mosaic.version = 11 : i64} {
  func.func @fused_forward_kernel(%arg0: i32, %arg1: memref<120x48xf32, #tpu.memory_space<vmem>>, %arg2: memref<48x256xf32, #tpu.memory_space<vmem>>, %arg3: memref<1x256xf32, #tpu.memory_space<vmem>>, %arg4: memref<3x256x64xf32, #tpu.memory_space<vmem>>, %arg5: memref<1x64xf32, #tpu.memory_space<vmem>>, %arg6: memref<3x12x38xf32, #tpu.memory_space<vmem>>, %arg7: memref<2x12xf32, #tpu.memory_space<vmem>>, %arg8: memref<64x2xf32, #tpu.memory_space<vmem>>, %arg9: memref<1x2xf32, #tpu.memory_space<vmem>>, %arg10: memref<2x2xf32, #tpu.memory_space<vmem>>) attributes {dimension_semantics = [#tpu.dimension_semantics<arbitrary>], iteration_bounds = array<i64: 1>, scalar_prefetch = 0 : i64, scratch_operands = 0 : i64, tpu.core_type = #tpu.core_type<tc>, window_params = [{pipeline_mode = #tpu.pipeline_mode<synchronous>, transform_indices = @transform_0, window_bounds = array<i64: 120, 48>}, {pipeline_mode = #tpu.pipeline_mode<synchronous>, transform_indices = @transform_1, window_bounds = array<i64: 48, 256>}, {pipeline_mode = #tpu.pipeline_mode<synchronous>, transform_indices = @transform_2, window_bounds = array<i64: 1, 256>}, {pipeline_mode = #tpu.pipeline_mode<synchronous>, transform_indices = @transform_3, window_bounds = array<i64: 3, 256, 64>}, {pipeline_mode = #tpu.pipeline_mode<synchronous>, transform_indices = @transform_4, window_bounds = array<i64: 1, 64>}, {pipeline_mode = #tpu.pipeline_mode<synchronous>, transform_indices = @transform_5, window_bounds = array<i64: 3, 12, 38>}, {pipeline_mode = #tpu.pipeline_mode<synchronous>, transform_indices = @transform_6, window_bounds = array<i64: 2, 12>}, {pipeline_mode = #tpu.pipeline_mode<synchronous>, transform_indices = @transform_7, window_bounds = array<i64: 64, 2>}, {pipeline_mode = #tpu.pipeline_mode<synchronous>, transform_indices = @transform_8, window_bounds = array<i64: 1, 2>}, {pipeline_mode = #tpu.pipeline_mode<synchronous>, transform_indices = @transform_9, window_bounds = array<i64: 2, 2>}]} {
    %c0 = arith.constant 0 : index
    %c0_0 = arith.constant 0 : index
    %0 = vector.load %arg1[%c0, %c0_0] : memref<120x48xf32, #tpu.memory_space<vmem>>, vector<120x48xf32>
    %c0_1 = arith.constant 0 : index
    %c0_2 = arith.constant 0 : index
    %1 = vector.load %arg2[%c0_1, %c0_2] : memref<48x256xf32, #tpu.memory_space<vmem>>, vector<48x256xf32>
    %cst = arith.constant dense<0.000000e+00> : vector<120x256xf32>
    %2 = tpu.matmul %0, %1, %cst {dimension_numbers = #tpu.dot_dimension_numbers<[1], [0], [0], [1], [0, 0, 1, 1], [], []>} : vector<120x48xf32>, vector<48x256xf32>, vector<120x256xf32> -> vector<120x256xf32>
    %c0_3 = arith.constant 0 : index
    %c0_4 = arith.constant 0 : index
    %3 = vector.load %arg3[%c0_3, %c0_4] : memref<1x256xf32, #tpu.memory_space<vmem>>, vector<1x256xf32>
    %4 = vector.broadcast %3 : vector<1x256xf32> to vector<120x256xf32>
    %5 = arith.addf %2, %4 : vector<120x256xf32>
    %cst_5 = arith.constant 0.000000e+00 : f32
    %6 = vector.broadcast %cst_5 : f32 to vector<120x256xf32>
    %7 = arith.maximumf %5, %6 : vector<120x256xf32>
    %8 = vector.extract_strided_slice %7 {offsets = [0, 0], sizes = [40, 256], strides = [1, 1]} : vector<120x256xf32> to vector<40x256xf32>
    %9 = vector.extract_strided_slice %7 {offsets = [40, 0], sizes = [40, 256], strides = [1, 1]} : vector<120x256xf32> to vector<40x256xf32>
    %10 = arith.maximumf %8, %9 : vector<40x256xf32>
    %11 = vector.extract_strided_slice %7 {offsets = [80, 0], sizes = [40, 256], strides = [1, 1]} : vector<120x256xf32> to vector<40x256xf32>
    %12 = arith.maximumf %10, %11 : vector<40x256xf32>
    %13 = vector.extract_strided_slice %12 {offsets = [0, 0], sizes = [38, 256], strides = [1, 1]} : vector<40x256xf32> to vector<38x256xf32>
    %c0_6 = arith.constant 0 : index
    %c0_7 = arith.constant 0 : index
    %c0_8 = arith.constant 0 : index
    %14 = vector.load %arg4[%c0_6, %c0_7, %c0_8] : memref<3x256x64xf32, #tpu.memory_space<vmem>>, vector<1x256x64xf32>
    %15 = vector.shape_cast %14 : vector<1x256x64xf32> to vector<256x64xf32>
    %cst_9 = arith.constant dense<0.000000e+00> : vector<38x64xf32>
    %16 = tpu.matmul %13, %15, %cst_9 {dimension_numbers = #tpu.dot_dimension_numbers<[1], [0], [0], [1], [0, 0, 1, 1], [], []>} : vector<38x256xf32>, vector<256x64xf32>, vector<38x64xf32> -> vector<38x64xf32>
    %17 = vector.extract_strided_slice %12 {offsets = [1, 0], sizes = [38, 256], strides = [1, 1]} : vector<40x256xf32> to vector<38x256xf32>
    %c1 = arith.constant 1 : index
    %c0_10 = arith.constant 0 : index
    %c0_11 = arith.constant 0 : index
    %18 = vector.load %arg4[%c1, %c0_10, %c0_11] : memref<3x256x64xf32, #tpu.memory_space<vmem>>, vector<1x256x64xf32>
    %19 = vector.shape_cast %18 : vector<1x256x64xf32> to vector<256x64xf32>
    %cst_12 = arith.constant dense<0.000000e+00> : vector<38x64xf32>
    %20 = tpu.matmul %17, %19, %cst_12 {dimension_numbers = #tpu.dot_dimension_numbers<[1], [0], [0], [1], [0, 0, 1, 1], [], []>} : vector<38x256xf32>, vector<256x64xf32>, vector<38x64xf32> -> vector<38x64xf32>
    %21 = arith.addf %16, %20 : vector<38x64xf32>
    %22 = vector.extract_strided_slice %12 {offsets = [2, 0], sizes = [38, 256], strides = [1, 1]} : vector<40x256xf32> to vector<38x256xf32>
    %c2 = arith.constant 2 : index
    %c0_13 = arith.constant 0 : index
    %c0_14 = arith.constant 0 : index
    %23 = vector.load %arg4[%c2, %c0_13, %c0_14] : memref<3x256x64xf32, #tpu.memory_space<vmem>>, vector<1x256x64xf32>
    %24 = vector.shape_cast %23 : vector<1x256x64xf32> to vector<256x64xf32>
    %cst_15 = arith.constant dense<0.000000e+00> : vector<38x64xf32>
    %25 = tpu.matmul %22, %24, %cst_15 {dimension_numbers = #tpu.dot_dimension_numbers<[1], [0], [0], [1], [0, 0, 1, 1], [], []>} : vector<38x256xf32>, vector<256x64xf32>, vector<38x64xf32> -> vector<38x64xf32>
    %26 = arith.addf %21, %25 : vector<38x64xf32>
    %c0_16 = arith.constant 0 : index
    %c0_17 = arith.constant 0 : index
    %27 = vector.load %arg5[%c0_16, %c0_17] : memref<1x64xf32, #tpu.memory_space<vmem>>, vector<1x64xf32>
    %28 = vector.broadcast %27 : vector<1x64xf32> to vector<38x64xf32>
    %29 = arith.addf %26, %28 : vector<38x64xf32>
    %cst_18 = arith.constant 0.000000e+00 : f32
    %30 = vector.broadcast %cst_18 : f32 to vector<38x64xf32>
    %31 = arith.maximumf %29, %30 : vector<38x64xf32>
    %c0_19 = arith.constant 0 : index
    %c0_20 = arith.constant 0 : index
    %c0_21 = arith.constant 0 : index
    %32 = vector.load %arg6[%c0_19, %c0_20, %c0_21] : memref<3x12x38xf32, #tpu.memory_space<vmem>>, vector<1x12x38xf32>
    %33 = vector.shape_cast %32 : vector<1x12x38xf32> to vector<12x38xf32>
    %cst_22 = arith.constant dense<0.000000e+00> : vector<12x64xf32>
    %34 = tpu.matmul %33, %31, %cst_22 {dimension_numbers = #tpu.dot_dimension_numbers<[1], [0], [0], [1], [0, 0, 1, 1], [], []>} : vector<12x38xf32>, vector<38x64xf32>, vector<12x64xf32> -> vector<12x64xf32>
    %c1_23 = arith.constant 1 : index
    %c0_24 = arith.constant 0 : index
    %c0_25 = arith.constant 0 : index
    %35 = vector.load %arg6[%c1_23, %c0_24, %c0_25] : memref<3x12x38xf32, #tpu.memory_space<vmem>>, vector<1x12x38xf32>
    %36 = vector.shape_cast %35 : vector<1x12x38xf32> to vector<12x38xf32>
    %cst_26 = arith.constant dense<0.000000e+00> : vector<12x64xf32>
    %37 = tpu.matmul %36, %31, %cst_26 {dimension_numbers = #tpu.dot_dimension_numbers<[1], [0], [0], [1], [0, 0, 1, 1], [], []>} : vector<12x38xf32>, vector<38x64xf32>, vector<12x64xf32> -> vector<12x64xf32>
    %c2_27 = arith.constant 2 : index
    %c0_28 = arith.constant 0 : index
    %c0_29 = arith.constant 0 : index
    %38 = vector.load %arg6[%c2_27, %c0_28, %c0_29] : memref<3x12x38xf32, #tpu.memory_space<vmem>>, vector<1x12x38xf32>
    %39 = vector.shape_cast %38 : vector<1x12x38xf32> to vector<12x38xf32>
    %cst_30 = arith.constant dense<0.000000e+00> : vector<12x64xf32>
    %40 = tpu.matmul %39, %31, %cst_30 {dimension_numbers = #tpu.dot_dimension_numbers<[1], [0], [0], [1], [0, 0, 1, 1], [], []>} : vector<12x38xf32>, vector<38x64xf32>, vector<12x64xf32> -> vector<12x64xf32>
    %41 = arith.maximumf %34, %37 : vector<12x64xf32>
    %42 = arith.maximumf %41, %40 : vector<12x64xf32>
    %c0_31 = arith.constant 0 : index
    %c0_32 = arith.constant 0 : index
    %43 = vector.load %arg7[%c0_31, %c0_32] : memref<2x12xf32, #tpu.memory_space<vmem>>, vector<2x12xf32>
    %cst_33 = arith.constant dense<0.000000e+00> : vector<2x64xf32>
    %44 = tpu.matmul %43, %42, %cst_33 {dimension_numbers = #tpu.dot_dimension_numbers<[1], [0], [0], [1], [0, 0, 1, 1], [], []>} : vector<2x12xf32>, vector<12x64xf32>, vector<2x64xf32> -> vector<2x64xf32>
    %c0_34 = arith.constant 0 : index
    %c0_35 = arith.constant 0 : index
    %45 = vector.load %arg8[%c0_34, %c0_35] : memref<64x2xf32, #tpu.memory_space<vmem>>, vector<64x2xf32>
    %cst_36 = arith.constant dense<0.000000e+00> : vector<2x2xf32>
    %46 = tpu.matmul %44, %45, %cst_36 {dimension_numbers = #tpu.dot_dimension_numbers<[1], [0], [0], [1], [0, 0, 1, 1], [], []>} : vector<2x64xf32>, vector<64x2xf32>, vector<2x2xf32> -> vector<2x2xf32>
    %c0_37 = arith.constant 0 : index
    %c0_38 = arith.constant 0 : index
    %47 = vector.load %arg9[%c0_37, %c0_38] : memref<1x2xf32, #tpu.memory_space<vmem>>, vector<1x2xf32>
    %48 = vector.broadcast %47 : vector<1x2xf32> to vector<2x2xf32>
    %49 = arith.addf %46, %48 : vector<2x2xf32>
    %cst_39 = arith.constant dense<0xFF800000> : vector<2xf32>
    %50 = vector.multi_reduction <maximumf>, %49, %cst_39 [1] : vector<2x2xf32> to vector<2xf32>
    %51 = vector.shape_cast %50 : vector<2xf32> to vector<2x1xf32>
    %52 = vector.broadcast %51 : vector<2x1xf32> to vector<2x2xf32>
    %53 = arith.subf %49, %52 : vector<2x2xf32>
    %54 = math.exp %53 : vector<2x2xf32>
    %cst_40 = arith.constant dense<0.000000e+00> : vector<2xf32>
    %55 = vector.multi_reduction <add>, %54, %cst_40 [1] : vector<2x2xf32> to vector<2xf32>
    %56 = vector.shape_cast %55 : vector<2xf32> to vector<2x1xf32>
    %57 = vector.broadcast %56 : vector<2x1xf32> to vector<2x2xf32>
    %58 = arith.divf %54, %57 : vector<2x2xf32>
    %c0_41 = arith.constant 0 : index
    %c0_42 = arith.constant 0 : index
    %59 = vector.load %arg10[%c0_41, %c0_42] : memref<2x2xf32, #tpu.memory_space<vmem>>, vector<2x2xf32>
    tpu.vector_store %arg10[%c0_41, %c0_42], %58 {strides = array<i32>} : memref<2x2xf32, #tpu.memory_space<vmem>>, vector<2x2xf32>,
    return
  }
  func.func @transform_0(%arg0: i32) -> (i32, i32) {
    %c0_i32 = arith.constant 0 : i32
    %c0_i32_0 = arith.constant 0 : i32
    %c0_i32_1 = arith.constant 0 : i32
    return %c0_i32, %c0_i32_0 : i32, i32
  }
  func.func @transform_1(%arg0: i32) -> (i32, i32) {
    %c0_i32 = arith.constant 0 : i32
    %c0_i32_0 = arith.constant 0 : i32
    %c0_i32_1 = arith.constant 0 : i32
    return %c0_i32, %c0_i32_0 : i32, i32
  }
  func.func @transform_2(%arg0: i32) -> (i32, i32) {
    %c0_i32 = arith.constant 0 : i32
    %c0_i32_0 = arith.constant 0 : i32
    %c0_i32_1 = arith.constant 0 : i32
    return %c0_i32, %c0_i32_0 : i32, i32
  }
  func.func @transform_3(%arg0: i32) -> (i32, i32, i32) {
    %c0_i32 = arith.constant 0 : i32
    %c0_i32_0 = arith.constant 0 : i32
    %c0_i32_1 = arith.constant 0 : i32
    %c0_i32_2 = arith.constant 0 : i32
    return %c0_i32, %c0_i32_0, %c0_i32_1 : i32, i32, i32
  }
  func.func @transform_4(%arg0: i32) -> (i32, i32) {
    %c0_i32 = arith.constant 0 : i32
    %c0_i32_0 = arith.constant 0 : i32
    %c0_i32_1 = arith.constant 0 : i32
    return %c0_i32, %c0_i32_0 : i32, i32
  }
  func.func @transform_5(%arg0: i32) -> (i32, i32, i32) {
    %c0_i32 = arith.constant 0 : i32
    %c0_i32_0 = arith.constant 0 : i32
    %c0_i32_1 = arith.constant 0 : i32
    %c0_i32_2 = arith.constant 0 : i32
    return %c0_i32, %c0_i32_0, %c0_i32_1 : i32, i32, i32
  }
  func.func @transform_6(%arg0: i32) -> (i32, i32) {
    %c0_i32 = arith.constant 0 : i32
    %c0_i32_0 = arith.constant 0 : i32
    %c0_i32_1 = arith.constant 0 : i32
    return %c0_i32, %c0_i32_0 : i32, i32
  }
  func.func @transform_7(%arg0: i32) -> (i32, i32) {
    %c0_i32 = arith.constant 0 : i32
    %c0_i32_0 = arith.constant 0 : i32
    %c0_i32_1 = arith.constant 0 : i32
    return %c0_i32, %c0_i32_0 : i32, i32
  }
  func.func @transform_8(%arg0: i32) -> (i32, i32) {
    %c0_i32 = arith.constant 0 : i32
    %c0_i32_0 = arith.constant 0 : i32
    %c0_i32_1 = arith.constant 0 : i32
    return %c0_i32, %c0_i32_0 : i32, i32
  }
  func.func @transform_9(%arg0: i32) -> (i32, i32) {
    %c0_i32 = arith.constant 0 : i32
    %c0_i32_0 = arith.constant 0 : i32
    %c0_i32_1 = arith.constant 0 : i32
    return %c0_i32, %c0_i32_0 : i32, i32
  }
}

</mosaic_0001>

<bundles_post_ra>
// kernel: model_1dcnn_pallas.1
= control target key start
LH: loop header
LB: loop body
LE: loop exit
PB: predicated region body
PF: predicated region fallthrough
CT: control target
= control target key end

     0   :  { %s1747_s0 = inlined_call_operand.vmem [shape: f32[120,48], index: 0, kind: input, shape index: {}]   ;;  %s1748_s1 = inlined_call_operand.vmem [shape: f32[48,256], index: 1, kind: input, shape index: {}]   ;;  %s1749_s2 = inlined_call_operand.vmem [shape: f32[1,256], index: 2, kind: input, shape index: {}]   ;;  %s1750_s3 = inlined_call_operand.vmem [shape: f32[3,256,64], index: 3, kind: input, shape index: {}]   ;;  %s1751_s4 = inlined_call_operand.vmem [shape: f32[1,64], index: 4, kind: input, shape index: {}]   ;;  %s1752_s5 = inlined_call_operand.vmem [shape: f32[3,12,38], index: 5, kind: input, shape index: {}]   ;;  %s1753_s6 = inlined_call_operand.vmem [shape: f32[2,12], index: 6, kind: input, shape index: {}]   ;;  %s1754_s7 = inlined_call_operand.vmem [shape: f32[64,2], index: 7, kind: input, shape index: {}]   ;;  %s1755_s8 = inlined_call_operand.vmem [shape: f32[1,2], index: 8, kind: input, shape index: {}]   ;;  %s1756_s9 = inlined_call_operand.hbm [shape: f32[2,2], index: 9, kind: output, shape index: {}]  }
   0x1   :  { %v58_v0 = vld [vmem:[%s1748_s1 + $0x50] sm:$0xff]  ;;  %v59_v1 = vld [vmem:[%s1748_s1 + $0x58] sm:$0xff]  ;;  %v56_v2 = vld [vmem:[%s1748_s1 + $0x40] sm:$0xff] }
   0x2   :  { %122 = vmatpush.msra.mxu0 %v58_v0  ;;  %184 = vmatpush.msra.mxu1 %v59_v1  ;;  %v57_v3 = vld [vmem:[%s1748_s1 + $0x48] sm:$0xff]  ;;  %v54_v4 = vld [vmem:[%s1748_s1 + $0x30] sm:$0xff]  ;;  %v55_v5 = vld [vmem:[%s1748_s1 + $0x38] sm:$0xff] }
   0x3   :  { %v52_v6 = vld [vmem:[%s1748_s1 + $0x20] sm:$0xff]  ;;  %v53_v7 = vld [vmem:[%s1748_s1 + $0x28] sm:$0xff]  ;;  %v50_v8 = vld [vmem:[%s1748_s1 + $0x10] sm:$0xff] }
   0x4   :  { %123 = vmatpush.msra.mxu0 %v56_v2  ;;  %185 = vmatpush.msra.mxu1 %v57_v3  ;;  %v51_v9 = vld [vmem:[%s1748_s1 + $0x18] sm:$0xff] }
   0x6   :  { %124 = vmatpush.msra.mxu0 %v54_v4  ;;  %186 = vmatpush.msra.mxu1 %v55_v5 }
   0x7   :  { %14 = vsyncpa [#allocation3], 0  ;;  %v48_v10 = vld [vmem:[%s1748_s1] sm:$0xff]  ;;  %v49_v11 = vld [vmem:[%s1748_s1 + $0x8] sm:$0xff]  ;;  %vm66_vm0 = vcmask 392192   ;;  %vm361_vm1 = vcmask 1046528  }
   0x8   :  { %125 = vmatpush.msra.mxu0 %v52_v6  ;;  %187 = vmatpush.msra.mxu1 %v53_v7  ;;  %v33_v12 = vld [vmem:[%s1747_s0] sm:$0xff]  ;;  %v34_v13 = vld [vmem:[%s1747_s0 + $0x8] sm:$0xff]  ;;  %v35_v14 = vld [vmem:[%s1747_s0 + $0x10] sm:$0xff]  ;;  %vm551_vm2 = vcmask 1045504   ;;  %vm665_vm3 = vcmask 310272   ;;  %vm771_vm4 = vcmask 1043456  }
   0x9   :  { %v36_v15 = vld [vmem:[%s1747_s0 + $0x18] sm:$0xff]  ;;  %v37_v16 = vld [vmem:[%s1747_s0 + $0x20] sm:$0xff]  ;;  %v38_v17 = vld [vmem:[%s1747_s0 + $0x28] sm:$0xff]  ;;  %vm767_vm5 = vcmask 97280   ;;  %vm807_vm6 = vcmask 523264   ;;  %vm831_vm7 = vcmask 9216  }
   0xa   :  { %126 = vmatpush.msra.mxu0 %v50_v8  ;;  %188 = vmatpush.msra.mxu1 %v51_v9  ;;  %v39_v18 = vld [vmem:[%s1747_s0 + $0x30] sm:$0xff]  ;;  %v40_v19 = vld [vmem:[%s1747_s0 + $0x38] sm:$0xff]  ;;  %v41_v20 = vld [vmem:[%s1747_s0 + $0x40] sm:$0xff]  ;;  %s864_s28 = sshll.u32 %s1756_s9, 4  ;;  %s865_s28 = int_to_ptr.hbm [resolvable:$true] %s864_s28 }
   0xb   :  { %v42_v21 = vld [vmem:[%s1747_s0 + $0x48] sm:$0xff]  ;;  %v43_v22 = vld [vmem:[%s1747_s0 + $0x50] sm:$0xff]  ;;  %v44_v23 = vld [vmem:[%s1747_s0 + $0x58] sm:$0xff] }
   0xc   :  { %127 = vmatpush.msra.mxu0 %v48_v10  ;;  %189 = vmatpush.msra.mxu1 %v49_v11  ;;  %v45_v24 = vld [vmem:[%s1747_s0 + $0x60] sm:$0xff]  ;;  %v46_v25 = vld [vmem:[%s1747_s0 + $0x68] sm:$0xff]  ;;  %v47_v26 = vld [vmem:[%s1747_s0 + $0x70] sm:$0xff] }
   0xd   :  { %873 = vmatmul.msk.f32.vlgmr.msra.gmra.mxu0 %vm66_vm0, %v33_v12  ;;  %888 = vmatmul.msk.f32.vlgmr.msra.gmra.mxu1 %vm66_vm0, %v33_v12  ;;  %v918_v37 = vld [vmem:[%s1750_s3 + $0x178] sm:$0xff]  ;;  %v917_v39 = vld [vmem:[%s1750_s3 + $0x170] sm:$0xff]  ;;  %v916_v41 = vld [vmem:[%s1750_s3 + $0x168] sm:$0xff] }
   0xe   :  { %v934_v38 = vld [vmem:[%s1750_s3 + $0x1f8] sm:$0xff]  ;;  %390 = vmatpush.msra.mxu2 %v918_v37  ;;  %v933_v40 = vld [vmem:[%s1750_s3 + $0x1f0] sm:$0xff]  ;;  %v932_v42 = vld [vmem:[%s1750_s3 + $0x1e8] sm:$0xff] }
   0xf   :  { %422 = vmatpush.msra.mxu3 %v934_v38  ;;  %v915_v45 = vld [vmem:[%s1750_s3 + $0x160] sm:$0xff]  ;;  %v914_v47 = vld [vmem:[%s1750_s3 + $0x158] sm:$0xff]  ;;  %v913_v49 = vld [vmem:[%s1750_s3 + $0x150] sm:$0xff] }
  0x10   :  { %391 = vmatpush.msra.mxu2 %v917_v39  ;;  %v931_v46 = vld [vmem:[%s1750_s3 + $0x1e0] sm:$0xff]  ;;  %v930_v48 = vld [vmem:[%s1750_s3 + $0x1d8] sm:$0xff]  ;;  %v929_v50 = vld [vmem:[%s1750_s3 + $0x1d0] sm:$0xff] }
  0x11   :  { %423 = vmatpush.msra.mxu3 %v933_v40  ;;  %v912_v51 = vld [vmem:[%s1750_s3 + $0x148] sm:$0xff]  ;;  %v911_v55 = vld [vmem:[%s1750_s3 + $0x140] sm:$0xff]  ;;  %v910_v57 = vld [vmem:[%s1750_s3 + $0x138] sm:$0xff] }
  0x12   :  { %392 = vmatpush.msra.mxu2 %v916_v41  ;;  %v928_v52 = vld [vmem:[%s1750_s3 + $0x1c8] sm:$0xff]  ;;  %v927_v56 = vld [vmem:[%s1750_s3 + $0x1c0] sm:$0xff]  ;;  %v926_v58 = vld [vmem:[%s1750_s3 + $0x1b8] sm:$0xff] }
  0x13   :  { %424 = vmatpush.msra.mxu3 %v932_v42  ;;  %v909_v59 = vld [vmem:[%s1750_s3 + $0x130] sm:$0xff]  ;;  %v908_v61 = vld [vmem:[%s1750_s3 + $0x128] sm:$0xff]  ;;  %v907_v1 = vld [vmem:[%s1750_s3 + $0x120] sm:$0xff] }
  0x14   :  { %393 = vmatpush.msra.mxu2 %v915_v45  ;;  %v925_v60 = vld [vmem:[%s1750_s3 + $0x1b0] sm:$0xff]  ;;  %v924_v62 = vld [vmem:[%s1750_s3 + $0x1a8] sm:$0xff]  ;;  %v923_v2 = vld [vmem:[%s1750_s3 + $0x1a0] sm:$0xff] }
  0x15   :  { %874 = vmatmul.msk.f32.gmra.mxu0 %vm66_vm0, %v34_v13  ;;  %889 = vmatmul.msk.f32.gmra.mxu1 %vm66_vm0, %v34_v13  ;;  %v906_v3 = vld [vmem:[%s1750_s3 + $0x118] sm:$0xff]  ;;  %v905_v5 = vld [vmem:[%s1750_s3 + $0x110] sm:$0xff]  ;;  %v904_v7 = vld [vmem:[%s1750_s3 + $0x108] sm:$0xff] }
  0x16   :  { %425 = vmatpush.msra.mxu3 %v931_v46  ;;  %394 = vmatpush.msra.mxu2 %v914_v47  ;;  %v922_v4 = vld [vmem:[%s1750_s3 + $0x198] sm:$0xff]  ;;  %v921_v6 = vld [vmem:[%s1750_s3 + $0x190] sm:$0xff]  ;;  %v920_v8 = vld [vmem:[%s1750_s3 + $0x188] sm:$0xff] }
  0x17   :  { %v903_v11 = vld [vmem:[%s1750_s3 + $0x100] sm:$0xff]  ;;  %v313_v45 = vld [vmem:[%s1750_s3 + $0xd8] sm:$0xff] }
  0x18   :  { %426 = vmatpush.msra.mxu3 %v930_v48  ;;  %395 = vmatpush.msra.mxu2 %v913_v49  ;;  %v919_v12 = vld [vmem:[%s1750_s3 + $0x180] sm:$0xff]  ;;  %v296_v49 = vld [vmem:[%s1750_s3 + $0x50] sm:$0xff] }
  0x19   :  { %v298_v38 = vld [vmem:[%s1750_s3 + $0x60] sm:$0xff] }
  0x1a   :  { %427 = vmatpush.msra.mxu3 %v929_v50  ;;  %396 = vmatpush.msra.mxu2 %v912_v51  ;;  %v314_v39 = vld [vmem:[%s1750_s3 + $0xe0] sm:$0xff]  ;;  %v312_v50 = vld [vmem:[%s1750_s3 + $0xd0] sm:$0xff]  ;;  %v295_v51 = vld [vmem:[%s1750_s3 + $0x48] sm:$0xff] }
  0x1c   :  { %428 = vmatpush.msra.mxu3 %v928_v52  ;;  %397 = vmatpush.msra.mxu2 %v911_v55  ;;  %v311_v52 = vld [vmem:[%s1750_s3 + $0xc8] sm:$0xff] }
  0x1d   :  { %875 = vmatmul.msk.f32.gmra.mxu0 %vm66_vm0, %v35_v14  ;;  %890 = vmatmul.msk.f32.gmra.mxu1 %vm66_vm0, %v35_v14 }
  0x1e   :  { %429 = vmatpush.msra.mxu3 %v927_v56  ;;  %398 = vmatpush.msra.mxu2 %v910_v57  ;;  %v294_v57 = vld [vmem:[%s1750_s3 + $0x40] sm:$0xff] }
  0x20   :  { %430 = vmatpush.msra.mxu3 %v926_v58  ;;  %399 = vmatpush.msra.mxu2 %v909_v59 }
  0x22   :  { %431 = vmatpush.msra.mxu3 %v925_v60  ;;  %400 = vmatpush.msra.mxu2 %v908_v61 }
  0x24   :  { %432 = vmatpush.msra.mxu3 %v924_v62  ;;  %401 = vmatpush.msra.mxu2 %v907_v1 }
  0x25   :  { %876 = vmatmul.msk.f32.gmra.mxu0 %vm66_vm0, %v36_v15  ;;  %891 = vmatmul.msk.f32.gmra.mxu1 %vm66_vm0, %v36_v15  ;;  %v301_v15 = vld [vmem:[%s1750_s3 + $0x78] sm:$0xff] }
  0x26   :  { %433 = vmatpush.msra.mxu3 %v923_v2  ;;  %402 = vmatpush.msra.mxu2 %v906_v3 }
  0x28   :  { %434 = vmatpush.msra.mxu3 %v922_v4  ;;  %403 = vmatpush.msra.mxu2 %v905_v5 }
  0x2a   :  { %435 = vmatpush.msra.mxu3 %v921_v6  ;;  %404 = vmatpush.msra.mxu2 %v904_v7 }
  0x2c   :  { %436 = vmatpush.msra.mxu3 %v920_v8  ;;  %405 = vmatpush.msra.mxu2 %v903_v11 }
  0x2d   :  { %877 = vmatmul.msk.f32.gmra.mxu0 %vm66_vm0, %v37_v16  ;;  %892 = vmatmul.msk.f32.gmra.mxu1 %vm66_vm0, %v37_v16  ;;  %v317_v16 = vld [vmem:[%s1750_s3 + $0xf8] sm:$0xff] }
  0x2e   :  { %437 = vmatpush.msra.mxu3 %v919_v12  ;;  %454 = vmatpush.msrb.mxu2 %v301_v15  ;;  %v309_v12 = vld [vmem:[%s1750_s3 + $0xb8] sm:$0xff] }
  0x30   :  { %486 = vmatpush.msrb.mxu3 %v317_v16 }
  0x35   :  { %878 = vmatmul.msk.f32.gmra.mxu0 %vm66_vm0, %v38_v17  ;;  %893 = vmatmul.msk.f32.gmra.mxu1 %vm66_vm0, %v38_v17  ;;  %v60_v17 = vld [vmem:[%s1749_s2] sm:$0x3] }
  0x3d   :  { %879 = vmatmul.msk.f32.gmra.mxu0 %vm66_vm0, %v39_v18  ;;  %894 = vmatmul.msk.f32.gmra.mxu1 %vm66_vm0, %v39_v18  ;;  %v300_v18 = vld [vmem:[%s1750_s3 + $0x70] sm:$0xff] }
  0x3e   :  { %455 = vmatpush.msrb.mxu2 %v300_v18 }
  0x45   :  { %880 = vmatmul.msk.f32.gmra.mxu0 %vm66_vm0, %v40_v19  ;;  %895 = vmatmul.msk.f32.gmra.mxu1 %vm66_vm0, %v40_v19  ;;  %v316_v19 = vld [vmem:[%s1750_s3 + $0xf0] sm:$0xff] }
  0x46   :  { %487 = vmatpush.msrb.mxu3 %v316_v19  ;;  %v308_v19 = vld [vmem:[%s1750_s3 + $0xb0] sm:$0xff] }
  0x4d   :  { %881 = vmatmul.msk.f32.gmra.mxu0 %vm66_vm0, %v41_v20  ;;  %896 = vmatmul.msk.f32.gmra.mxu1 %vm66_vm0, %v41_v20  ;;  %v299_v20 = vld [vmem:[%s1750_s3 + $0x68] sm:$0xff] }
  0x4e   :  { %456 = vmatpush.msrb.mxu2 %v299_v20 }
  0x50   :  { %457 = vmatpush.msrb.mxu2 %v298_v38 }
  0x55   :  { %882 = vmatmul.msk.f32.gmra.mxu0 %vm66_vm0, %v42_v21  ;;  %897 = vmatmul.msk.f32.gmra.mxu1 %vm66_vm0, %v42_v21  ;;  %v315_v21 = vld [vmem:[%s1750_s3 + $0xe8] sm:$0xff] }
  0x56   :  { %488 = vmatpush.msrb.mxu3 %v315_v21 }
  0x58   :  { %489 = vmatpush.msrb.mxu3 %v314_v39 }
  0x5a   :  { %490 = vmatpush.msrb.mxu3 %v313_v45 }
  0x5c   :  { %491 = vmatpush.msrb.mxu3 %v312_v50  ;;  %v306_v50 = vld [vmem:[%s1750_s3 + $0xa0] sm:$0xff] }
  0x5d   :  { %883 = vmatmul.msk.f32.gmra.mxu0 %vm66_vm0, %v43_v22  ;;  %898 = vmatmul.msk.f32.gmra.mxu1 %vm66_vm0, %v43_v22  ;;  %v1340_v22 = vperm.slane %v60_v17, 0 }
  0x5e   :  { %492 = vmatpush.msrb.mxu3 %v311_v52 }
  0x65   :  { %884 = vmatmul.msk.f32.gmra.mxu0 %vm66_vm0, %v44_v23  ;;  %899 = vmatmul.msk.f32.gmra.mxu1 %vm66_vm0, %v44_v23  ;;  %v1342_v23 = vperm.slane %v60_v17, 1 }
  0x6d   :  { %885 = vmatmul.msk.f32.gmra.mxu0 %vm66_vm0, %v45_v24  ;;  %900 = vmatmul.msk.f32.gmra.mxu1 %vm66_vm0, %v45_v24 }
  0x75   :  { %886 = vmatmul.msk.f32.gmra.mxu0 %vm66_vm0, %v46_v25  ;;  %901 = vmatmul.msk.f32.gmra.mxu1 %vm66_vm0, %v46_v25 }
  0x7d   :  { %887 = vmatmul.msk.f32.gmra.mxu0 %vm66_vm0, %v47_v26  ;;  %902 = vmatmul.msk.f32.gmra.mxu1 %vm66_vm0, %v47_v26 }
  0x8a   :  { %v1183_v27 = vpop.f32.mrf.mxu0  ;;  %v1185_v28 = vpop.f32.mrf.mxu1 }
  0x8b   :  { %v130_v40 = vadd.f32 %v1183_v27, %v1340_v22  ;;  %v192_v41 = vadd.f32 %v1185_v28, %v1342_v23 }
  0x92   :  { %v1187_v29 = vpop.f32.mrf.mxu0  ;;  %v1189_v30 = vpop.f32.mrf.mxu1 }
  0x93   :  { %v133_v46 = vadd.f32 %v1187_v29, %v1340_v22  ;;  %v195_v29 = vadd.f32 %v1189_v30, %v1342_v23  ;;  %v310_v30 = vld [vmem:[%s1750_s3 + $0xc0] sm:$0xff] }
  0x94   :  { %493 = vmatpush.msrb.mxu3 %v310_v30 }
  0x95   :  { %v238_v58 = vmax.f32 %v133_v46, 0.0  ;;  %v239_v5 = vmax.f32 %v195_v29, 0.0 }
  0x96   :  { %494 = vmatpush.msrb.mxu3 %v309_v12 }
  0x98   :  { %495 = vmatpush.msrb.mxu3 %v308_v19  ;;  %v302_v19 = vld [vmem:[%s1750_s3 + $0x80] sm:$0xff] }
  0x9a   :  { %v1191_v31 = vpop.f32.mrf.mxu0  ;;  %v1193_v32 = vpop.f32.mrf.mxu1 }
  0x9b   :  { %v1394_v61 = vadd.f32 %v1191_v31, %v1340_v22  ;;  %v198_v21 = vadd.f32 %v1193_v32, %v1342_v23 }
  0x9d   :  { %v240_v20 = vmax.f32 %v1394_v61, 0.0  ;;  %v241_v46 = vmax.f32 %v198_v21, 0.0 }
  0xa2   :  { %v1195_v33 = vpop.f32.mrf.mxu0  ;;  %v1197_v34 = vpop.f32.mrf.mxu1 }
  0xa3   :  { %v139_v61 = vadd.f32 %v1195_v33, %v1340_v22  ;;  %v303_v33 = vld [vmem:[%s1750_s3 + $0x88] sm:$0xff] }
  0xa5   :  { %v242_v12 = vmax.f32 %v139_v61, 0.0  ;;  %v965_v61 = vld [vmem:[%s1750_s3 + $0x2f0] sm:$0xff] }
  0xaa   :  { %v1199_v35 = vpop.f32.mrf.mxu0  ;;  %v1201_v36 = vpop.f32.mrf.mxu1 }
  0xb2   :  { %v1221_v43 = vpop.f32.mrf.mxu0  ;;  %v1223_v44 = vpop.f32.mrf.mxu1 }
  0xb3   :  { %v145_v24 = vadd.f32 %v1221_v43, %v1340_v22  ;;  %v207_v25 = vadd.f32 %v1223_v44, %v1342_v23  ;;  %v297_v44 = vld [vmem:[%s1750_s3 + $0x58] sm:$0xff] }
  0xb4   :  { %458 = vmatpush.msrb.mxu2 %v297_v44 }
  0xb5   :  { %v246_v47 = vmax.f32 %v145_v24, 0.0  ;;  %v247_v48 = vmax.f32 %v207_v25, 0.0  ;;  %v291_v24 = vld [vmem:[%s1750_s3 + $0x28] sm:$0xff] }
  0xb6   :  { %459 = vmatpush.msrb.mxu2 %v296_v49  ;;  %v307_v25 = vld [vmem:[%s1750_s3 + $0xa8] sm:$0xff] }
  0xb7   :  { %496 = vmatpush.msrb.mxu3 %v307_v25 }
  0xb8   :  { %460 = vmatpush.msrb.mxu2 %v295_v51 }
  0xb9   :  { %497 = vmatpush.msrb.mxu3 %v306_v50 }
  0xba   :  { %v1249_v53 = vpop.f32.mrf.mxu0  ;;  %v1251_v54 = vpop.f32.mrf.mxu1  ;;  %461 = vmatpush.msrb.mxu2 %v294_v57 }
  0xbb   :  { %v148_v27 = vadd.f32 %v1249_v53, %v1340_v22  ;;  %v210_v28 = vadd.f32 %v1251_v54, %v1342_v23  ;;  %v236_v53 = vmax.f32 %v130_v40, 0.0  ;;  %v237_v54 = vmax.f32 %v192_v41, 0.0  ;;  %v290_v41 = vld [vmem:[%s1750_s3 + $0x20] sm:$0xff] }
  0xbd   :  { %v248_v59 = vmax.f32 %v148_v27, 0.0  ;;  %v249_v60 = vmax.f32 %v210_v28, 0.0  ;;  %v266_v62 = vmax.f32 %v236_v53, %v246_v47  ;;  %v267_v1 = vmax.f32 %v237_v54, %v247_v48  ;;  %v289_v54 = vld [vmem:[%s1750_s3 + $0x18] sm:$0xff] }
  0xbf   :  { %v268_v15 = vmax.f32 %v238_v58, %v248_v59  ;;  %v269_v16 = vmax.f32 %v239_v5, %v249_v60 }
  0xc2   :  { %v1277_v63 = vpop.f32.mrf.mxu0  ;;  %v1279_v0 = vpop.f32.mrf.mxu1 }
  0xc3   :  { %v1398_v2 = vadd.f32 %v1277_v63, %v1340_v22  ;;  %v213_v6 = vadd.f32 %v1279_v0, %v1342_v23  ;;  %v293_v63 = vld [vmem:[%s1750_s3 + $0x38] sm:$0xff]  ;;  %v292_v0 = vld [vmem:[%s1750_s3 + $0x30] sm:$0xff] }
  0xc4   :  { %462 = vmatpush.msrb.mxu2 %v293_v63 }
  0xc6   :  { %463 = vmatpush.msrb.mxu2 %v292_v0 }
  0xc8   :  { %464 = vmatpush.msrb.mxu2 %v291_v24 }
  0xca   :  { %v1305_v9 = vpop.f32.mrf.mxu0  ;;  %v1307_v10 = vpop.f32.mrf.mxu1  ;;  %465 = vmatpush.msrb.mxu2 %v290_v41 }
  0xcb   :  { %v154_v27 = vadd.f32 %v1305_v9, %v1340_v22  ;;  %v216_v9 = vadd.f32 %v1307_v10, %v1342_v23 }
  0xcc   :  { %466 = vmatpush.msrb.mxu2 %v289_v54  ;;  %v950_v54 = vld [vmem:[%s1750_s3 + $0x278] sm:$0xff] }
  0xcd   :  { %v252_v5 = vmax.f32 %v154_v27, 0.0 }
  0xd2   :  { %v1315_v13 = vpop.f32.mrf.mxu0  ;;  %v1317_v14 = vpop.f32.mrf.mxu1 }
  0xda   :  { %v159_v26 = vpop.f32.mrf.mxu0  ;;  %v221_v37 = vpop.f32.mrf.mxu1 }
  0xdb   :  { %v160_v42 = vadd.f32 %v159_v26, %v1340_v22  ;;  %v222_v43 = vadd.f32 %v221_v37, %v1342_v23  ;;  %v250_v26 = vmax.f32 %v1398_v2, 0.0  ;;  %v251_v37 = vmax.f32 %v213_v6, 0.0  ;;  %v287_v2 = vld [vmem:[%s1750_s3 + $0x8] sm:$0xff] }
  0xdc   :  { %v253_v6 = vmax.f32 %v216_v9, 0.0 }
  0xdd   :  { %v256_v55 = vmax.f32 %v160_v42, 0.0  ;;  %v257_v56 = vmax.f32 %v222_v43, 0.0  ;;  %v270_v30 = vmax.f32 %v240_v20, %v250_v26  ;;  %v271_v58 = vmax.f32 %v241_v46, %v251_v37 }
  0xdf   :  { %v1404_v31 = vmax.f32 %v266_v62, %v256_v55  ;;  %v1406_v11 = vmax.f32 %v267_v1, %v257_v56  ;;  %v305_v55 = vld [vmem:[%s1750_s3 + $0x98] sm:$0xff]  ;;  %v288_v56 = vld [vmem:[%s1750_s3 + $0x10] sm:$0xff]  ;;  %v201_v62 = vadd.f32 %v1197_v34, %v1342_v23 }
  0xe0   :  { %v304_v1 = vld [vmem:[%s1750_s3 + $0x90] sm:$0xff]  ;;  %498 = vmatpush.msrb.mxu3 %v305_v55  ;;  %467 = vmatpush.msrb.mxu2 %v288_v56  ;;  %v966_v55 = vld [vmem:[%s1750_s3 + $0x2f8] sm:$0xff] }
  0xe1   :  { %v362_v32 = vrot.slane %v1404_v31, 1  ;;  %v365_v40 = vrot.slane %v1406_v11, 1  ;;  %v552_v28 = vrot.slane %v1404_v31, 2  ;;  %v555_v47 = vrot.slane %v1406_v11, 2 }
  0xe2   :  { %v162_v3 = vpop.f32.mrf.mxu0  ;;  %v224_v4 = vpop.f32.mrf.mxu1  ;;  %499 = vmatpush.msrb.mxu3 %v304_v1  ;;  %468 = vmatpush.msrb.mxu2 %v287_v2  ;;  %v243_v0 = vmax.f32 %v201_v62, 0.0  ;;  %v948_v62 = vld [vmem:[%s1750_s3 + $0x268] sm:$0xff] }
  0xe3   :  { %v163_v7 = vadd.f32 %v162_v3, %v1340_v22  ;;  %v225_v8 = vadd.f32 %v224_v4, %v1342_v23  ;;  %v964_v1 = vld [vmem:[%s1750_s3 + $0x2e8] sm:$0xff] }
  0xe4   :  { %500 = vmatpush.msrb.mxu3 %v303_v33  ;;  %v963_v33 = vld [vmem:[%s1750_s3 + $0x2e0] sm:$0xff] }
  0xe5   :  { %v258_v17 = vmax.f32 %v163_v7, 0.0  ;;  %v259_v18 = vmax.f32 %v225_v8, 0.0 }
  0xe6   :  { %501 = vmatpush.msrb.mxu3 %v302_v19 }
  0xe7   :  { %v1430_v38 = vmax.f32 %v268_v15, %v258_v17  ;;  %v1432_v39 = vmax.f32 %v269_v16, %v259_v18  ;;  %v157_v15 = vadd.f32 %v1315_v13, %v1340_v22  ;;  %v286_v18 = vld [vmem:[%s1750_s3] sm:$0xff]  ;;  %v219_v13 = vadd.f32 %v1317_v14, %v1342_v23 }
  0xe8   :  { %469 = vmatpush.msrb.mxu2 %v286_v18  ;;  %v142_v14 = vadd.f32 %v1199_v35, %v1340_v22  ;;  %v945_v18 = vld [vmem:[%s1750_s3 + $0x250] sm:$0xff] }
  0xe9   :  { %v553_v42 = vrot.slane %v1430_v38, 2  ;;  %v556_v43 = vrot.slane %v1432_v39, 2  ;;  %v363_v44 = vrot.slane %v1430_v38, 1  ;;  %v366_v45 = vrot.slane %v1432_v39, 1 }
  0xea   :  { %v165_v48 = vpop.f32.mrf.mxu0  ;;  %v227_v49 = vpop.f32.mrf.mxu1  ;;  %v254_v27 = vmax.f32 %v157_v15, 0.0  ;;  %v244_v50 = vmax.f32 %v142_v14, 0.0  ;;  %v940_v14 = vld [vmem:[%s1750_s3 + $0x228] sm:$0xff] }
  0xeb   :  { %v166_v29 = vadd.f32 %v165_v48, %v1340_v22  ;;  %v228_v51 = vadd.f32 %v227_v49, %v1342_v23  ;;  %v364_v52 = vsel %vm361_vm1, %v362_v32, %v363_v44  ;;  %v367_v53 = vsel %vm361_vm1, %v365_v40, %v366_v45 }
  0xec   :  { %406 = vmatmul.f32.vlgmr.msra.gmra.mxu2 %v364_v52  ;;  %438 = vmatmul.f32.vlgmr.msra.gmra.mxu3 %v367_v53  ;;  %v1468_v57 = vsel %vm551_vm2, %v552_v28, %v553_v42  ;;  %v1473_v10 = vsel %vm551_vm2, %v555_v47, %v556_v43  ;;  %v272_v32 = vmax.f32 %v242_v12, %v252_v5  ;;  %v255_v28 = vmax.f32 %v219_v13, 0.0  ;;  %v959_v13 = vld [vmem:[%s1750_s3 + $0x2c0] sm:$0xff] }
  0xed   :  { %v260_v59 = vmax.f32 %v166_v29, 0.0  ;;  %v261_v60 = vmax.f32 %v228_v51, 0.0  ;;  %v273_v40 = vmax.f32 %v243_v0, %v253_v6  ;;  %580 = vmatpush.msra.mxu2 %v950_v54  ;;  %612 = vmatpush.msra.mxu3 %v966_v55  ;;  %v947_v6 = vld [vmem:[%s1750_s3 + $0x260] sm:$0xff] }
  0xef   :  { %v1485_v3 = vmax.f32 %v270_v30, %v260_v59  ;;  %v1487_v4 = vmax.f32 %v271_v58, %v261_v60  ;;  %v274_v30 = vmax.f32 %v244_v50, %v254_v27  ;;  %613 = vmatpush.msra.mxu3 %v965_v61  ;;  %v939_v27 = vld [vmem:[%s1750_s3 + $0x220] sm:$0xff] }
  0xf0   :  { %v935_v50 = vld [vmem:[%s1750_s3 + $0x200] sm:$0xff] }
  0xf1   :  { %v368_v34 = vrot.slane %v1485_v3, 1  ;;  %v370_v7 = vrot.slane %v1487_v4, 1  ;;  %v558_v8 = vrot.slane %v1485_v3, 2  ;;  %v560_v63 = vrot.slane %v1487_v4, 2  ;;  %614 = vmatpush.msra.mxu3 %v964_v1 }
  0xf2   :  { %v168_v16 = vpop.f32.mrf.mxu0  ;;  %v230_v17 = vpop.f32.mrf.mxu1 }
  0xf3   :  { %v169_v20 = vadd.f32 %v168_v16, %v1340_v22  ;;  %v231_v21 = vadd.f32 %v230_v17, %v1342_v23  ;;  %v369_v24 = vsel %vm361_vm1, %v363_v44, %v368_v34  ;;  %v371_v25 = vsel %vm361_vm1, %v366_v45, %v370_v7  ;;  %615 = vmatpush.msra.mxu3 %v963_v33  ;;  %v946_v16 = vld [vmem:[%s1750_s3 + $0x258] sm:$0xff] }
  0xf4   :  { %409 = vmatmul.f32.gmra.mxu2 %v369_v24  ;;  %441 = vmatmul.f32.gmra.mxu3 %v371_v25  ;;  %v1513_v26 = vsel %vm551_vm2, %v553_v42, %v558_v8  ;;  %v1518_v37 = vsel %vm551_vm2, %v556_v43, %v560_v63  ;;  %v204_v45 = vadd.f32 %v1201_v36, %v1342_v23  ;;  %v962_v17 = vld [vmem:[%s1750_s3 + $0x2d8] sm:$0xff]  ;;  %v960_v24 = vld [vmem:[%s1750_s3 + $0x2c8] sm:$0xff]  ;;  %v943_v25 = vld [vmem:[%s1750_s3 + $0x240] sm:$0xff] }
  0xf5   :  { %v262_v41 = vmax.f32 %v169_v20, 0.0  ;;  %v263_v44 = vmax.f32 %v231_v21, 0.0  ;;  %616 = vmatpush.msra.mxu3 %v962_v17  ;;  %v961_v20 = vld [vmem:[%s1750_s3 + $0x2d0] sm:$0xff]  ;;  %v944_v21 = vld [vmem:[%s1750_s3 + $0x248] sm:$0xff] }
  0xf6   :  { %v245_v29 = vmax.f32 %v204_v45, 0.0  ;;  %v956_v45 = vld [vmem:[%s1750_s3 + $0x2a8] sm:$0xff] }
  0xf7   :  { %v1524_v46 = vmax.f32 %v272_v32, %v262_v41  ;;  %v1526_v42 = vmax.f32 %v273_v40, %v263_v44  ;;  %617 = vmatpush.msra.mxu3 %v961_v20  ;;  %v942_v32 = vld [vmem:[%s1750_s3 + $0x238] sm:$0xff]  ;;  %v941_v41 = vld [vmem:[%s1750_s3 + $0x230] sm:$0xff] }
  0xf8   :  { %v275_v58 = vmax.f32 %v245_v29, %v255_v28  ;;  %v958_v40 = vld [vmem:[%s1750_s3 + $0x2b8] sm:$0xff]  ;;  %v957_v44 = vld [vmem:[%s1750_s3 + $0x2b0] sm:$0xff]  ;;  %v955_v28 = vld [vmem:[%s1750_s3 + $0x2a0] sm:$0xff] }
  0xf9   :  { %v372_v43 = vrot.slane %v1524_v46, 1  ;;  %v374_v47 = vrot.slane %v1526_v42, 1  ;;  %v562_v48 = vrot.slane %v1524_v46, 2  ;;  %v564_v49 = vrot.slane %v1526_v42, 2  ;;  %618 = vmatpush.msra.mxu3 %v960_v24  ;;  %v951_v29 = vld [vmem:[%s1750_s3 + $0x280] sm:$0xff] }
  0xfa   :  { %v171_v35 = vpop.f32.mrf.mxu0  ;;  %v233_v51 = vpop.f32.mrf.mxu1 }
  0xfb   :  { %v172_v36 = vadd.f32 %v171_v35, %v1340_v22  ;;  %v234_v52 = vadd.f32 %v233_v51, %v1342_v23  ;;  %v373_v53 = vsel %vm361_vm1, %v368_v34, %v372_v43  ;;  %v375_v9 = vsel %vm361_vm1, %v370_v7, %v374_v47  ;;  %v949_v22 = vld [vmem:[%s1750_s3 + $0x270] sm:$0xff]  ;;  %619 = vmatpush.msra.mxu3 %v959_v13 }
  0xfc   :  { %412 = vmatmul.f32.gmra.mxu2 %v373_v53  ;;  %444 = vmatmul.f32.gmra.mxu3 %v375_v9  ;;  %v1546_v23 = vsel %vm551_vm2, %v558_v8, %v562_v48  ;;  %v1549_v56 = vsel %vm551_vm2, %v560_v63, %v564_v49 }
  0xfd   :  { %v264_v59 = vmax.f32 %v172_v36, 0.0  ;;  %v265_v60 = vmax.f32 %v234_v52, 0.0  ;;  %581 = vmatpush.msra.mxu2 %v949_v22  ;;  %620 = vmatpush.msra.mxu3 %v958_v40 }
  0xff   :  { %v1560_v2 = vmax.f32 %v274_v30, %v264_v59  ;;  %v1562_v5 = vmax.f32 %v275_v58, %v265_v60  ;;  %582 = vmatpush.msra.mxu2 %v948_v62  ;;  %621 = vmatpush.msra.mxu3 %v957_v44  ;;  %v989_v44 = vld [vmem:[%s1751_s4] ss:$0 sm:$0xff] }
 0x101   :  { %v376_v34 = vrot.slane %v1560_v2, 1  ;;  %v378_v7 = vrot.slane %v1562_v5, 1  ;;  %v566_v8 = vrot.slane %v1560_v2, 2  ;;  %v568_v63 = vrot.slane %v1562_v5, 2  ;;  %583 = vmatpush.msra.mxu2 %v947_v6  ;;  %622 = vmatpush.msra.mxu3 %v956_v45 }
 0x103   :  { %v377_v12 = vsel %vm361_vm1, %v372_v43, %v376_v34  ;;  %v379_v0 = vsel %vm361_vm1, %v374_v47, %v378_v7  ;;  %v1579_v15 = vsel %vm551_vm2, %v562_v48, %v566_v8  ;;  %v1593_v19 = vsel %vm551_vm2, %v564_v49, %v568_v63  ;;  %584 = vmatpush.msra.mxu2 %v946_v16  ;;  %v938_v43 = vld [vmem:[%s1750_s3 + $0x218] sm:$0xff]  ;;  %v937_v48 = vld [vmem:[%s1750_s3 + $0x210] sm:$0xff]  ;;  %v952_v49 = vld [vmem:[%s1750_s3 + $0x288] sm:$0xff] }
 0x104   :  { %415 = vmatmul.f32.gmra.mxu2 %v377_v12  ;;  %447 = vmatmul.f32.gmra.mxu3 %v379_v0  ;;  %v954_v47 = vld [vmem:[%s1750_s3 + $0x298] sm:$0xff] }
 0x105   :  { %585 = vmatpush.msra.mxu2 %v945_v18  ;;  %623 = vmatpush.msra.mxu3 %v955_v28 }
 0x107   :  { %586 = vmatpush.msra.mxu2 %v944_v21  ;;  %624 = vmatpush.msra.mxu3 %v954_v47 }
 0x109   :  { %587 = vmatpush.msra.mxu2 %v943_v25 }
 0x10b   :  { %588 = vmatpush.msra.mxu2 %v942_v32 }
 0x10c   :  { %418 = vmatmul.f32.gmra.mxu2 %v376_v34  ;;  %450 = vmatmul.f32.gmra.mxu3 %v378_v7 }
 0x10d   :  { %589 = vmatpush.msra.mxu2 %v941_v41 }
 0x10f   :  { %590 = vmatpush.msra.mxu2 %v940_v14 }
 0x111   :  { %591 = vmatpush.msra.mxu2 %v939_v27 }
 0x113   :  { %592 = vmatpush.msra.mxu2 %v938_v43 }
 0x114   :  { %470 = vmatmul.f32.vlgmr.msrb.gmra.mxu2 %v1404_v31  ;;  %502 = vmatmul.f32.vlgmr.msrb.gmra.mxu3 %v1406_v11  ;;  %v953_v31 = vld [vmem:[%s1750_s3 + $0x290] sm:$0xff]  ;;  %v936_v11 = vld [vmem:[%s1750_s3 + $0x208] sm:$0xff] }
 0x115   :  { %593 = vmatpush.msra.mxu2 %v937_v48  ;;  %625 = vmatpush.msra.mxu3 %v953_v31 }
 0x117   :  { %594 = vmatpush.msra.mxu2 %v936_v11  ;;  %626 = vmatpush.msra.mxu3 %v952_v49 }
 0x119   :  { %595 = vmatpush.msra.mxu2 %v935_v50  ;;  %627 = vmatpush.msra.mxu3 %v951_v29 }
 0x11c   :  { %473 = vmatmul.f32.gmra.mxu2 %v1430_v38  ;;  %505 = vmatmul.f32.gmra.mxu3 %v1432_v39 }
 0x124   :  { %476 = vmatmul.f32.gmra.mxu2 %v1485_v3  ;;  %508 = vmatmul.f32.gmra.mxu3 %v1487_v4 }
 0x12c   :  { %479 = vmatmul.f32.gmra.mxu2 %v1524_v46  ;;  %511 = vmatmul.f32.gmra.mxu3 %v1526_v42 }
 0x134   :  { %482 = vmatmul.f32.gmra.mxu2 %v1560_v2  ;;  %514 = vmatmul.f32.gmra.mxu3 %v1562_v5 }
 0x13c   :  { %596 = vmatmul.f32.vlgmr.msra.gmra.mxu2 %v1468_v57  ;;  %628 = vmatmul.f32.vlgmr.msra.gmra.mxu3 %v1473_v10 }
 0x144   :  { %599 = vmatmul.f32.gmra.mxu2 %v1513_v26  ;;  %631 = vmatmul.f32.gmra.mxu3 %v1518_v37 }
 0x14c   :  { %602 = vmatmul.f32.gmra.mxu2 %v1546_v23  ;;  %634 = vmatmul.f32.gmra.mxu3 %v1549_v56 }
 0x154   :  { %605 = vmatmul.f32.gmra.mxu2 %v1579_v15  ;;  %637 = vmatmul.f32.gmra.mxu3 %v1593_v19 }
 0x15c   :  { %608 = vmatmul.f32.gmra.mxu2 %v566_v8  ;;  %640 = vmatmul.f32.gmra.mxu3 %v568_v63 }
 0x16f   :  { %v407_v38 = vpop.f32.mrf.mxu2  ;;  %v439_v39 = vpop.f32.mrf.mxu3 }
 0x170   :  { %v440_v57 = vadd.f32 %v439_v39, %v407_v38 }
 0x177   :  { %v410_v10 = vpop.f32.mrf.mxu2  ;;  %v442_v3 = vpop.f32.mrf.mxu3 }
 0x178   :  { %v443_v4 = vadd.f32 %v442_v3, %v410_v10  ;;  %v970_v10 = vld [vmem:[%s1752_s5 + $0x10] sm:$0xff]  ;;  %v976_v3 = vld [vmem:[%s1752_s5 + $0x28] sm:$0xf] }
 0x17f   :  { %v413_v26 = vpop.f32.mrf.mxu2  ;;  %v445_v37 = vpop.f32.mrf.mxu3 }
 0x180   :  { %v446_v46 = vadd.f32 %v445_v37, %v413_v26  ;;  %v971_v26 = vld [vmem:[%s1752_s5 + $0x18] sm:$0xf]  ;;  %v975_v37 = vld [vmem:[%s1752_s5 + $0x20] sm:$0xff] }
 0x187   :  { %v416_v42 = vpop.f32.mrf.mxu2  ;;  %v448_v35 = vpop.f32.mrf.mxu3 }
 0x188   :  { %v449_v51 = vadd.f32 %v448_v35, %v416_v42  ;;  %v801_v42 = vld [vmem:[%s1754_s7 + $0x30] sm:$0xff]  ;;  %v800_v35 = vld [vmem:[%s1754_s7 + $0x28] sm:$0xff] }
 0x18f   :  { %v419_v36 = vpop.f32.mrf.mxu2  ;;  %v451_v52 = vpop.f32.mrf.mxu3 }
 0x190   :  { %v452_v53 = vadd.f32 %v451_v52, %v419_v36  ;;  %v798_v36 = vld [vmem:[%s1754_s7 + $0x18] sm:$0xff]  ;;  %v797_v52 = vld [vmem:[%s1754_s7 + $0x10] sm:$0xff] }
 0x197   :  { %v471_v9 = vpop.f32.mrf.mxu2  ;;  %v503_v54 = vpop.f32.mrf.mxu3 }
 0x198   :  { %v472_v55 = vadd.f32 %v471_v9, %v440_v57  ;;  %v663_v57 = vld [vmem:[%s1752_s5] sm:$0xff] }
 0x19a   :  { %v504_v22 = vadd.f32 %v503_v54, %v472_v55 }
 0x19f   :  { %v474_v23 = vpop.f32.mrf.mxu2  ;;  %v506_v56 = vpop.f32.mrf.mxu3 }
 0x1a0   :  { %v475_v30 = vadd.f32 %v474_v23, %v443_v4  ;;  %v664_v4 = vld [vmem:[%s1752_s5 + $0x8] sm:$0xf] }
 0x1a2   :  { %v507_v58 = vadd.f32 %v506_v56, %v475_v30 }
 0x1a7   :  { %v477_v59 = vpop.f32.mrf.mxu2  ;;  %v509_v60 = vpop.f32.mrf.mxu3 }
 0x1a8   :  { %v478_v15 = vadd.f32 %v477_v59, %v446_v46  ;;  %v802_v46 = vld [vmem:[%s1754_s7 + $0x38] sm:$0xff] }
 0x1a9   :  { %819 = vmatpush.msrb.mxu2 %v802_v46 }
 0x1aa   :  { %v510_v20 = vadd.f32 %v509_v60, %v478_v15 }
 0x1ab   :  { %820 = vmatpush.msrb.mxu2 %v801_v42 }
 0x1ad   :  { %821 = vmatpush.msrb.mxu2 %v800_v35 }
 0x1af   :  { %v480_v61 = vpop.f32.mrf.mxu2  ;;  %v512_v62 = vpop.f32.mrf.mxu3 }
 0x1b0   :  { %v481_v0 = vadd.f32 %v480_v61, %v449_v51  ;;  %v799_v51 = vld [vmem:[%s1754_s7 + $0x20] sm:$0xff] }
 0x1b1   :  { %822 = vmatpush.msrb.mxu2 %v799_v51  ;;  %v766_v61 = vld [vmem:[%s1753_s6] sm:$0x3]  ;;  %s1021_s6 = smov [#allocation2]  }
 0x1b2   :  { %v513_v18 = vadd.f32 %v512_v62, %v481_v0  ;;  %v795_v62 = vld [vmem:[%s1754_s7] sm:$0xff] }
 0x1b3   :  { %823 = vmatpush.msrb.mxu2 %v798_v36 }
 0x1b5   :  { %824 = vmatpush.msrb.mxu2 %v797_v52 }
 0x1b7   :  { %v483_v1 = vpop.f32.mrf.mxu2  ;;  %v515_v2 = vpop.f32.mrf.mxu3 }
 0x1b8   :  { %v484_v16 = vadd.f32 %v483_v1, %v452_v53  ;;  %v796_v53 = vld [vmem:[%s1754_s7 + $0x8] sm:$0xff]  ;;  %s862_s7 = sshll.u32 %s1021_s6, 4  ;;  %s863_s7 = int_to_ptr.vmem [resolvable:$true] %s862_s7 }
 0x1b9   :  { %825 = vmatpush.msrb.mxu2 %v796_v53 }
 0x1ba   :  { %v516_v25 = vadd.f32 %v515_v2, %v484_v16  ;;  %v990_v2 = vld [vmem:[%s1755_s8] ss:$0 sm:$0xff] }
 0x1bb   :  { %826 = vmatpush.msrb.mxu2 %v795_v62 }
 0x1bf   :  { %v597_v5 = vpop.f32.mrf.mxu2  ;;  %v629_v6 = vpop.f32.mrf.mxu3 }
 0x1c0   :  { %v630_v41 = vadd.f32 %v629_v6, %v597_v5 }
 0x1c2   :  { %v644_v47 = vadd.f32 %v630_v41, %v504_v22 }
 0x1c4   :  { %v653_v50 = vadd.f32 %v989_v44, %v644_v47 }
 0x1c6   :  { %v658_v39 = vmax.f32 %v653_v50, 0.0 }
 0x1c7   :  { %v600_v33 = vpop.f32.mrf.mxu2  ;;  %v632_v34 = vpop.f32.mrf.mxu3 }
 0x1c8   :  { %v633_v13 = vadd.f32 %v632_v34, %v600_v33 }
 0x1ca   :  { %v645_v27 = vadd.f32 %v633_v13, %v507_v58 }
 0x1cc   :  { %v654_v11 = vadd.f32 %v989_v44, %v645_v27 }
 0x1ce   :  { %v659_v38 = vmax.f32 %v654_v11, 0.0 }
 0x1cf   :  { %v603_v7 = vpop.f32.mrf.mxu2  ;;  %v635_v8 = vpop.f32.mrf.mxu3 }
 0x1d0   :  { %v636_v19 = vadd.f32 %v635_v8, %v603_v7 }
 0x1d2   :  { %v646_v14 = vadd.f32 %v636_v19, %v510_v20 }
 0x1d4   :  { %v655_v48 = vadd.f32 %v989_v44, %v646_v14 }
 0x1d6   :  { %v660_v29 = vmax.f32 %v655_v48, 0.0 }
 0x1d7   :  { %v606_v63 = vpop.f32.mrf.mxu2  ;;  %v638_v12 = vpop.f32.mrf.mxu3 }
 0x1d8   :  { %v639_v17 = vadd.f32 %v638_v12, %v606_v63 }
 0x1da   :  { %v647_v32 = vadd.f32 %v639_v17, %v513_v18 }
 0x1dc   :  { %v656_v28 = vadd.f32 %v989_v44, %v647_v32 }
 0x1de   :  { %v661_v49 = vmax.f32 %v656_v28, 0.0 }
 0x1df   :  { %v609_v21 = vpop.f32.mrf.mxu2  ;;  %v641_v24 = vpop.f32.mrf.mxu3 }
 0x1e0   :  { %v642_v40 = vadd.f32 %v641_v24, %v609_v21 }
 0x1e2   :  { %v648_v45 = vadd.f32 %v642_v40, %v516_v25 }
 0x1e4   :  { %v657_v43 = vadd.f32 %v989_v44, %v648_v45 }
 0x1e6   :  { %v662_v31 = vmax.f32 %v657_v43, 0.0 }
 0x1e8   :  { %967 = vmatpush.msk.msrb.mxu0 %vm551_vm2, %v662_v31  ;;  %972 = vmatpush.msk.msrb.mxu1 %vm551_vm2, %v662_v31 }
 0x1e9   :  { %983 = vmatpush.msk.msrb.mxu3 %vm551_vm2, %v662_v31 }
 0x1ea   :  { %687 = vmatpush.msrb.mxu0 %v661_v49  ;;  %719 = vmatpush.msrb.mxu1 %v661_v49 }
 0x1eb   :  { %984 = vmatpush.msrb.mxu3 %v661_v49 }
 0x1ec   :  { %688 = vmatpush.msrb.mxu0 %v660_v29  ;;  %720 = vmatpush.msrb.mxu1 %v660_v29 }
 0x1ed   :  { %985 = vmatpush.msrb.mxu3 %v660_v29 }
 0x1ee   :  { %689 = vmatpush.msrb.mxu0 %v659_v38  ;;  %721 = vmatpush.msrb.mxu1 %v659_v38 }
 0x1ef   :  { %986 = vmatpush.msrb.mxu3 %v659_v38 }
 0x1f0   :  { %690 = vmatpush.msrb.mxu0 %v658_v39  ;;  %722 = vmatpush.msrb.mxu1 %v658_v39 }
 0x1f1   :  { %987 = vmatpush.msrb.mxu3 %v658_v39  ;;  %968 = vmatmul.msk.f32.vlgmr.msrb.gmra.mxu0 %vm665_vm3, %v663_v57 }
 0x1f2   :  { %977 = vmatpush.msk.msra.mxu0 %vm551_vm2, %v662_v31  ;;  %973 = vmatmul.msk.f32.vlgmr.msrb.gmra.mxu1 %vm665_vm3, %v970_v10 }
 0x1f3   :  { %979 = vmatmul.msk.f32.vlgmr.msrb.gmra.mxu3 %vm665_vm3, %v976_v3 }
 0x1f4   :  { %751 = vmatpush.msra.mxu0 %v661_v49 }
 0x1f6   :  { %752 = vmatpush.msra.mxu0 %v660_v29 }
 0x1f8   :  { %753 = vmatpush.msra.mxu0 %v659_v38 }
 0x1f9   :  { %969 = vmatmul.msk.f32.gmra.mxu0 %vm665_vm3, %v664_v4 }
 0x1fa   :  { %754 = vmatpush.msra.mxu0 %v658_v39  ;;  %974 = vmatmul.msk.f32.gmra.mxu1 %vm665_vm3, %v971_v26 }
 0x201   :  { %978 = vmatmul.msk.f32.vlgmr.msra.gmra.mxu0 %vm665_vm3, %v975_v37 }
 0x26e   :  { %v692_v9 = vpop.f32.mrf.mxu0 }
 0x26f   :  { %v724_v54 = vpop.f32.mrf.mxu1 }
 0x270   :  { %v762_v58 = vmax.f32 %v692_v9, %v724_v54 }
 0x276   :  { %v695_v55 = vpop.f32.mrf.mxu0  ;;  %v759_v23 = vpop.f32.mrf.mxu3 }
 0x277   :  { %v727_v22 = vpop.f32.mrf.mxu1 }
 0x278   :  { %v763_v56 = vmax.f32 %v695_v55, %v727_v22 }
 0x27a   :  { %v765_v30 = vmax.f32 %v763_v56, %v759_v23 }
 0x27c   :  { %980 = vmatpush.msk.msra.mxu1 %vm771_vm4, %v765_v30 }
 0x27e   :  { %v756_v59 = vpop.f32.mrf.mxu0 }
 0x27f   :  { %v764_v60 = vmax.f32 %v762_v58, %v756_v59 }
 0x281   :  { %790 = vmatpush.msra.mxu1 %v764_v60 }
 0x282   :  { %981 = vmatmul.msk.f32.vlgmr.msra.gmra.mxu1 %vm767_vm5, %v766_v61 }
 0x2ff   :  { %v792_v1 = vpop.f32.mrf.mxu1 }
 0x300   :  { %982 = vmatmul.msk.f32.vlgmr.msrb.gmra.mxu2 %vm807_vm6, %v792_v1 }
 0x383   :  { %v828_v5 = vpop.f32.mrf.mxu2 }
 0x384   :  { %v829_v6 = vadd.f32 %v990_v2, %v828_v5 }
 0x386   :  { %v832_v33 = vsel %vm831_vm7, %v829_v6, -inf }
 0x387   :  { %833 = vmax.xlane.f32.xlu0 %v832_v33 }
 0x3fa   :  { %v834_v34 = vpop.xlane.xlu0 %833 }
 0x3fb   :  { %v835_v7 = vsub.f32 %v829_v6, %v834_v34 }
 0x3fd   :  { %v836_v8 = vmul.f32 1.442695, %v835_v7 }
 0x3ff   :  { %991 = vpow2.f32 %v836_v8 }
 0x405   :  { %v992_v63 = vpop.eup %991 }
 0x406   :  { %v838_v12 = vsel %vm831_vm7, %v992_v63, 0.0 }
 0x407   :  { %839 = vadd.xlane.f32.xlu0 %v838_v12 }
 0x47a   :  { %v840_v0 = vpop.xlane.xlu0 %839 }
 0x47b   :  { %993 = vrcp.f32 %v840_v0  ;;  %v852_v18 = vand.u32 2147483648, %v840_v0  ;;  %v850_v20 = vand.u32 2147483647, %v840_v0  ;;  %vm846_vm9 = vweird.f32 %v840_v0 }
 0x47d   :  { %v853_v24 = vor.u32 1.1754944e-38, %v852_v18  ;;  %vm851_vm11 = vcmp.eq.f32.partialorder %v850_v20, 8.507059e+37 }
 0x481   :  { %v994_v15 = vpop.eup %993 }
 0x482   :  { %v842_v16 = vmul.f32 %v994_v15, %v840_v0  ;;  %vm847_vm8 = vweird.f32 %v994_v15 }
 0x483   :  { %vm848_vm10 = vmor %vm846_vm9, %vm847_vm8 }
 0x484   :  { %v843_v17 = vsub.f32 1.0, %v842_v16 }
 0x486   :  { %v844_v19 = vmul.f32 %v994_v15, %v843_v17 }
 0x488   :  { %v845_v21 = vadd.f32 %v994_v15, %v844_v19 }
 0x48a   :  { %v849_v25 = vsel %vm848_vm10, %v994_v15, %v845_v21 }
 0x48b   :  { %v854_v13 = vsel %vm851_vm11, %v853_v24, %v849_v25 }
 0x48c   :  { %v855_v32 = vmul.f32 %v992_v63, %v854_v13 }
 0x48e   :  { %856 = vst.msk [vmem:[#allocation2] sm:$0x3] %vm831_vm7, %v855_v32 }
 0x48f   :  { %867 = dma.vmem_to_hbm [thread:$0]  %s863_s7, 32, %s865_s28, [#allocation3]  }
 0x490   :  { %1019 = dma.done.wait [#allocation3], 32  }
 0x491   :  { %1020 = vsyncadd [#allocation3], 4294967264 }
 0x492   :  { %872 = vsyncpa [#allocation3], 1 }

</bundles_post_ra>
